<compile_context>
chip_gen: v6e
topology: v6e:2x2x1
jax: 0.10.0
libtpu: 0.0.40
codegen_flags: <defaults>
</compile_context>

<pallas_src>
import functools

import jax
import jax.numpy as jnp
from jax.experimental import pallas as pl
from jax.experimental.pallas import tpu as pltpu


def _round_up(x, m):
    return ((x + m - 1) // m) * m


# ----------------------------------------------------------------------------
# Pallas kernel: one GIN layer.
#   aggregate (A+I) @ Y  (Y = X @ W1', pre-transformed, resident in VMEM)
#   epilogue: + b1' -> ReLU -> @ W2' -> + b2'  [-> ReLU -> @ W1_next'  if fused]
# ----------------------------------------------------------------------------
def gin_layer_kernel(adj_ref, y_ref, b1_ref, w2_ref, b2_ref, *rest,
                     tk, fuse_next):
    if fuse_next:
        wnext_ref, o_ref, acc_ref = rest
    else:
        o_ref, acc_ref = rest

    k = pl.program_id(1)

    @pl.when(k == 0)
    def _():
        acc_ref[...] = jnp.zeros_like(acc_ref)

    # Y is resident (full-array block); slice the K-chunk of source nodes.
    start = pl.multiple_of(k * tk, tk)
    y_blk = y_ref[pl.ds(start, tk), :]                       # [TK, Hp] bf16
    # Aggregation partial sum: bf16 x bf16 -> f32 accumulate on the MXU.
    acc_ref[...] += jnp.dot(adj_ref[...], y_blk,
                            preferred_element_type=jnp.float32)

    @pl.when(k == pl.num_programs(1) - 1)
    def _():
        # Bias + ReLU applied directly to the f32 accumulator (no recast).
        h = jnp.maximum(acc_ref[...] + b1_ref[...], 0.0)     # [TM, Hp] f32
        out = jnp.dot(h.astype(jnp.bfloat16), w2_ref[...],
                      preferred_element_type=jnp.float32) + b2_ref[...]
        if fuse_next:
            # Inter-layer relu(dropout(x)) with p=0, then next layer's Linear1
            # (associativity: aggregate (A+I) @ (x @ W1_next') in layer 1).
            out = jnp.maximum(out, 0.0)
            out = jnp.dot(out.astype(jnp.bfloat16), wnext_ref[...],
                          preferred_element_type=jnp.float32)
        o_ref[...] = out.astype(o_ref.dtype)


def _gin_layer(adj, y, b1, w2, b2, w_next, *, tm, tk, out_dtype):
    n_pad = adj.shape[0]
    h_in = y.shape[1]                      # Hp (padded hidden width)
    cout = w2.shape[1]
    fuse_next = w_next is not None
    out_cols = w_next.shape[1] if fuse_next else cout
    grid = (n_pad // tm, n_pad // tk)

    flops = (2 * n_pad * n_pad * h_in            # aggregation
             + 2 * n_pad * h_in * cout           # Linear2
             + (2 * n_pad * cout * out_cols if fuse_next else 0))
    bytes_accessed = (adj.size * 2                 # adj streamed once
                      + y.size * 2                 # Y resident, DMA'd once
                      + w2.size * 2 + b1.size * 4 + b2.size * 4
                      + (w_next.size * 2 if fuse_next else 0)
                      + n_pad * out_cols * jnp.dtype(out_dtype).itemsize)

    in_specs = [
        pl.BlockSpec((tm, tk), lambda i, k: (i, k)),            # adj (streamed)
        pl.BlockSpec((n_pad, h_in), lambda i, k: (0, 0)),       # Y (resident, DMA once)
        pl.BlockSpec((1, h_in), lambda i, k: (0, 0)),           # b1'
        pl.BlockSpec((h_in, cout), lambda i, k: (0, 0)),        # W2' (resident)
        pl.BlockSpec((1, cout), lambda i, k: (0, 0)),           # b2'
    ]
    args = [adj, y, b1, w2, b2]
    if fuse_next:
        in_specs.append(pl.BlockSpec((cout, out_cols), lambda i, k: (0, 0)))
        args.append(w_next)

    kernel = functools.partial(gin_layer_kernel, tk=tk, fuse_next=fuse_next)

    return pl.pallas_call(
        kernel,
        out_shape=jax.ShapeDtypeStruct((n_pad, out_cols), out_dtype),
        grid_spec=pltpu.PrefetchScalarGridSpec(
            num_scalar_prefetch=0,
            grid=grid,
            in_specs=in_specs,
            out_specs=pl.BlockSpec((tm, out_cols), lambda i, k: (i, 0)),
            scratch_shapes=[pltpu.VMEM((tm, h_in), jnp.float32)],
        ),
        compiler_params=pltpu.CompilerParams(
            dimension_semantics=("parallel", "arbitrary"),
            # Budgeted for v7x's 64 MiB physical VMEM (plan ~= 2x adj tile
            # + resident Y + weights + f32 acc << 48 MiB); v5e/v6e have headroom.
            vmem_limit_bytes=48 * 1024 * 1024,
        ),
        cost_estimate=pl.CostEstimate(flops=flops, transcendentals=0,
                                      bytes_accessed=bytes_accessed),
    )(*args)


# ----------------------------------------------------------------------------
# Parameter construction (deterministic, in-script)
# ----------------------------------------------------------------------------
def _linear_params(key, fan_in, fan_out):
    """PyTorch-style Linear init: U(-1/sqrt(fan_in), 1/sqrt(fan_in))."""
    kw, kb = jax.random.split(key)
    bound = 1.0 / jnp.sqrt(jnp.float32(fan_in))
    w = jax.random.uniform(kw, (fan_in, fan_out), jnp.float32, -bound, bound)
    b = jax.random.uniform(kb, (1, fan_out), jnp.float32, -bound, bound)
    return w, b


def _bn_params(key, channels, eps=1e-5):
    """BatchNorm1d (eval) folded to per-channel scale/shift."""
    kg, kb = jax.random.split(key)
    gamma = 1.0 + 0.1 * jax.random.normal(kg, (1, channels), jnp.float32)
    beta = 0.1 * jax.random.normal(kb, (1, channels), jnp.float32)
    running_mean = jnp.zeros((1, channels), jnp.float32)
    running_var = jnp.ones((1, channels), jnp.float32)
    scale = gamma / jnp.sqrt(running_var + eps)
    shift = beta - running_mean * scale
    return scale, shift


def make_gin_params(key, in_channels, hidden, out_channels):
    keys = jax.random.split(key, 8)
    w1a, b1a = _linear_params(keys[0], in_channels, hidden)
    s1a, t1a = _bn_params(keys[1], hidden)
    w2a, b2a = _linear_params(keys[2], hidden, hidden)
    s2a, t2a = _bn_params(keys[3], hidden)
    w1b, b1b = _linear_params(keys[4], hidden, hidden)
    s1b, t1b = _bn_params(keys[5], hidden)
    w2b, b2b = _linear_params(keys[6], hidden, out_channels)
    s2b, t2b = _bn_params(keys[7], out_channels)
    return (w1a, b1a, s1a, t1a, w2a, b2a, s2a, t2a,
            w1b, b1b, s1b, t1b, w2b, b2b, s2b, t2b)


def prepare_kernel_params(raw_params):
    """Fold BN into Linear, zero-pad channel dims to 128 lanes, cast MXU weights to bf16.

    Layout matches the associativity scheme:
      layer0 = (W1a' f32 unpadded  -> host pre-transform Y0 = X @ W1a',
                b1a', W2a', b2a', W1b' (next layer's Linear1, fused into epilogue))
      layer1 = (b1b', W2b', b2b')
    """
    (w1a, b1a, s1a, t1a, w2a, b2a, s2a, t2a,
     w1b, b1b, s1b, t1b, w2b, b2b, s2b, t2b) = raw_params
    hidden = w1a.shape[1]
    out_ch = w2b.shape[1]
    h_p = _round_up(hidden, 128)
    cout_p = _round_up(out_ch, 128)

    def fold(w, b, s, t):
        return w * s, b * s + t                    # column-scale + shift

    def pad_w(w, rows_p, cols_p):
        return (jnp.zeros((rows_p, cols_p), jnp.float32)
                .at[:w.shape[0], :w.shape[1]].set(w).astype(jnp.bfloat16))

    def pad_b(b, cols_p):
        return jnp.zeros((1, cols_p), jnp.float32).at[:, :b.shape[1]].set(b)

    w1a_f, b1a_f = fold(w1a, b1a, s1a, t1a)
    w2a_f, b2a_f = fold(w2a, b2a, s2a, t2a)
    w1b_f, b1b_f = fold(w1b, b1b, s1b, t1b)
    w2b_f, b2b_f = fold(w2b, b2b, s2b, t2b)

    layer0 = (w1a_f,                                   # f32, unpadded (host matmul)
              pad_b(b1a_f, h_p),
              pad_w(w2a_f, h_p, h_p),
              pad_b(b2a_f, h_p),
              pad_w(w1b_f, h_p, h_p))                  # fused next-layer Linear1
    layer1 = (pad_b(b1b_f, h_p),
              pad_w(w2b_f, h_p, cout_p),
              pad_b(b2b_f, cout_p))
    return layer0, layer1


# ----------------------------------------------------------------------------
# Wrapper
# ----------------------------------------------------------------------------
def _pick_tile(n128, cap):
    """Largest power-of-two multiple of 128 that is <= min(cap, n128)."""
    t = 128
    while t * 2 <= min(cap, n128):
        t *= 2
    return t


@functools.partial(jax.jit, static_argnames=("out_channels",))
def gin_net_forward(x, edge_index, layer0_params, layer1_params, out_channels):
    """x: [N, in_channels] f32; edge_index: [2, E] int32 (row 0 = src, row 1 = dst)."""
    n = x.shape[0]
    w1a_f, b1a, w2a, b2a, w1b = layer0_params
    b1b, w2b, b2b = layer1_params
    h_p = b1a.shape[1]

    # Tile plan (all static).  TM/TK are power-of-two multiples of 128, so
    # n_pad = round_up(n, max(TM, TK)) is a multiple of BOTH (grid covers every row).
    n128 = _round_up(n, 128)
    tk = _pick_tile(n128, 1024)
    # Cap TM at ~n/2 so grid_i >= 2 when possible (v7x dual-TensorCore), max 512.
    tm = _pick_tile(n128, min(512, max(128, n128 // 2)))
    n_pad = _round_up(n, max(tm, tk))

    # Adjacency A + I (GINConv eps=0): self-loops folded in via concatenated
    # indices, single scatter-add directly into bf16 (no f32 N^2 temp / cast pass).
    src, dst = edge_index[0], edge_index[1]
    loops = jnp.arange(n, dtype=edge_index.dtype)
    rows = jnp.concatenate([dst, loops])
    cols = jnp.concatenate([src, loops])
    adj = jnp.zeros((n_pad, n_pad), jnp.bfloat16).at[rows, cols].add(
        jnp.ones((rows.shape[0],), jnp.bfloat16))
    # TODO(synk): fp8 adj (v7x) / int8 MXU path (v5e/v6e) or CSR gather for sparse graphs.

    # Layer-0 pre-transform (associativity): Y0 = X @ W1a'  (tiny XLA matmul),
    # zero-padded to lane-dense (n_pad, h_p) bf16.
    hidden = w1a_f.shape[1]
    y0 = jnp.zeros((n_pad, h_p), jnp.float32).at[:n, :hidden].set(x @ w1a_f)
    y0 = y0.astype(jnp.bfloat16)

    # Layer 0: aggregate (A+I)@Y0, epilogue +b1a' relu @W2a' +b2a' relu @W1b'
    # -> produces Y1 (layer 1's pre-transformed features) in bf16.
    y1 = _gin_layer(adj, y0, b1a, w2a, b2a, w1b,
                    tm=tm, tk=tk, out_dtype=jnp.bfloat16)
    # Layer 1: aggregate (A+I)@Y1, epilogue +b1b' relu @W2b' +b2b'; f32 output.
    out = _gin_layer(adj, y1, b1b, w2b, b2b, None,
                     tm=tm, tk=tk, out_dtype=jnp.float32)
    return out[:n, :out_channels]


# ----------------------------------------------------------------------------
# Pure-JAX f32 reference (unfolded params, same eval-mode semantics)
# ----------------------------------------------------------------------------
def gin_net_reference(x, edge_index, raw_params):
    (w1a, b1a, s1a, t1a, w2a, b2a, s2a, t2a,
     w1b, b1b, s1b, t1b, w2b, b2b, s2b, t2b) = raw_params
    n = x.shape[0]
    src, dst = edge_index[0], edge_index[1]
    adj = jnp.zeros((n, n), jnp.float32).at[dst, src].add(1.0) + jnp.eye(n)

    h = adj @ x
    h = jnp.maximum((h @ w1a + b1a) * s1a + t1a, 0.0)
    h = (h @ w2a + b2a) * s2a + t2a
    h = jnp.maximum(h, 0.0)
    h = adj @ h
    h = jnp.maximum((h @ w1b + b1b) * s1b + t1b, 0.0)
    h = (h @ w2b + b2b) * s2b + t2b
    return h


if __name__ == "__main__":
    key = jax.random.PRNGKey(0)
    k_x, k_edge, k_params = jax.random.split(key, 3)

    N = 16            # nodes
    E = 40            # edges
    IN_CH = 4
    HIDDEN = 32
    OUT_CH = 8

    x = jax.random.normal(k_x, (N, IN_CH), dtype=jnp.float32)
    edge_index = jax.random.randint(k_edge, (2, E), 0, N, dtype=jnp.int32)

    raw_params = make_gin_params(k_params, IN_CH, HIDDEN, OUT_CH)
    layer0_params, layer1_params = prepare_kernel_params(raw_params)

    out = gin_net_forward(x, edge_index, layer0_params, layer1_params,
                          out_channels=OUT_CH)
    out = jax.block_until_ready(out)

    ref = gin_net_reference(x, edge_index, raw_params)
    assert out.shape == (N, OUT_CH), out.shape
    # bf16 MXU inputs with f32 accumulation: allow a few percent vs pure-f32 ref.
    assert jnp.allclose(out, ref, atol=5e-2, rtol=5e-2), (
        "mismatch vs reference, max abs err = %r" % float(jnp.max(jnp.abs(out - ref))))

    print("KERNEL_OK")
</pallas_src>

<mosaic_0001>
module attributes {stable_mosaic.version = 11 : i64} {
  func.func @gin_layer_kernel(%arg0: i32, %arg1: i32, %arg2: memref<128x128xbf16, #tpu.memory_space<vmem>>, %arg3: memref<128x128xbf16, #tpu.memory_space<vmem>>, %arg4: memref<1x128xf32, #tpu.memory_space<vmem>>, %arg5: memref<128x128xbf16, #tpu.memory_space<vmem>>, %arg6: memref<1x128xf32, #tpu.memory_space<vmem>>, %arg7: memref<128x128xf32, #tpu.memory_space<vmem>>, %arg8: memref<128x128xf32, #tpu.memory_space<vmem>>) attributes {dimension_semantics = [#tpu.dimension_semantics<parallel>, #tpu.dimension_semantics<arbitrary>], iteration_bounds = array<i64: 1, 1>, scalar_prefetch = 0 : i64, scratch_operands = 1 : i64, tpu.core_type = #tpu.core_type<tc>, window_params = [{transform_indices = @transform_0, window_bounds = array<i64: 128, 128>}, {pipeline_mode = #tpu.pipeline_mode<synchronous>, transform_indices = @transform_1, window_bounds = array<i64: 128, 128>}, {pipeline_mode = #tpu.pipeline_mode<synchronous>, transform_indices = @transform_2, window_bounds = array<i64: 1, 128>}, {pipeline_mode = #tpu.pipeline_mode<synchronous>, transform_indices = @transform_3, window_bounds = array<i64: 128, 128>}, {pipeline_mode = #tpu.pipeline_mode<synchronous>, transform_indices = @transform_4, window_bounds = array<i64: 1, 128>}, {transform_indices = @transform_5, window_bounds = array<i64: 128, 128>}]} {
    %c0_i32 = arith.constant 0 : i32
    %0 = arith.cmpi eq, %arg1, %c0_i32 : i32
    %1 = arith.extui %0 : i1 to i32
    %c0_i32_0 = arith.constant 0 : i32
    %2 = arith.cmpi ne, %1, %c0_i32_0 : i32
    scf.if %2 {
      %cst_9 = arith.constant 0.000000e+00 : f32
      %15 = vector.broadcast %cst_9 : f32 to vector<128x128xf32>
      %c0_10 = arith.constant 0 : index
      %c0_11 = arith.constant 0 : index
      %16 = vector.load %arg8[%c0_10, %c0_11] : memref<128x128xf32, #tpu.memory_space<vmem>>, vector<128x128xf32>
      tpu.vector_store %arg8[%c0_10, %c0_11], %15 {strides = array<i32>} : memref<128x128xf32, #tpu.memory_space<vmem>>, vector<128x128xf32>,
    } else {
    }
    %c128_i32 = arith.constant 128 : i32
    %3 = arith.muli %arg1, %c128_i32 : i32
    %4 = tpu.assume_multiple %3, 128 : i32
    %5 = arith.index_cast %4 : i32 to index
    %c0 = arith.constant 0 : index
    %6 = vector.load %arg3[%5, %c0] : memref<128x128xbf16, #tpu.memory_space<vmem>>, vector<128x128xbf16>
    %c0_1 = arith.constant 0 : index
    %c0_2 = arith.constant 0 : index
    %7 = vector.load %arg8[%c0_1, %c0_2] : memref<128x128xf32, #tpu.memory_space<vmem>>, vector<128x128xf32>
    %c0_3 = arith.constant 0 : index
    %c0_4 = arith.constant 0 : index
    %8 = vector.load %arg2[%c0_3, %c0_4] : memref<128x128xbf16, #tpu.memory_space<vmem>>, vector<128x128xbf16>
    %cst = arith.constant dense<0.000000e+00> : vector<128x128xf32>
    %9 = tpu.matmul %8, %6, %cst {dimension_numbers = #tpu.dot_dimension_numbers<[1], [0], [0], [1], [0, 0, 1, 1], [], []>} : vector<128x128xbf16>, vector<128x128xbf16>, vector<128x128xf32> -> vector<128x128xf32>
    %10 = arith.addf %7, %9 : vector<128x128xf32>
    %c0_5 = arith.constant 0 : index
    %c0_6 = arith.constant 0 : index
    %11 = vector.load %arg8[%c0_5, %c0_6] : memref<128x128xf32, #tpu.memory_space<vmem>>, vector<128x128xf32>
    tpu.vector_store %arg8[%c0_5, %c0_6], %10 {strides = array<i32>} : memref<128x128xf32, #tpu.memory_space<vmem>>, vector<128x128xf32>,
    %c0_i32_7 = arith.constant 0 : i32
    %12 = arith.cmpi eq, %arg1, %c0_i32_7 : i32
    %13 = arith.extui %12 : i1 to i32
    %c0_i32_8 = arith.constant 0 : i32
    %14 = arith.cmpi ne, %13, %c0_i32_8 : i32
    scf.if %14 {
      %c0_9 = arith.constant 0 : index
      %c0_10 = arith.constant 0 : index
      %15 = vector.load %arg8[%c0_9, %c0_10] : memref<128x128xf32, #tpu.memory_space<vmem>>, vector<128x128xf32>
      %c0_11 = arith.constant 0 : index
      %c0_12 = arith.constant 0 : index
      %16 = vector.load %arg4[%c0_11, %c0_12] : memref<1x128xf32, #tpu.memory_space<vmem>>, vector<1x128xf32>
      %17 = vector.broadcast %16 : vector<1x128xf32> to vector<128x128xf32>
      %18 = arith.addf %15, %17 : vector<128x128xf32>
      %cst_13 = arith.constant 0.000000e+00 : f32
      %19 = vector.broadcast %cst_13 : f32 to vector<128x128xf32>
      %20 = arith.maximumf %18, %19 : vector<128x128xf32>
      %21 = arith.truncf %20 : vector<128x128xf32> to vector<128x128xbf16>
      %c0_14 = arith.constant 0 : index
      %c0_15 = arith.constant 0 : index
      %22 = vector.load %arg5[%c0_14, %c0_15] : memref<128x128xbf16, #tpu.memory_space<vmem>>, vector<128x128xbf16>
      %cst_16 = arith.constant dense<0.000000e+00> : vector<128x128xf32>
      %23 = tpu.matmul %21, %22, %cst_16 {dimension_numbers = #tpu.dot_dimension_numbers<[1], [0], [0], [1], [0, 0, 1, 1], [], []>} : vector<128x128xbf16>, vector<128x128xbf16>, vector<128x128xf32> -> vector<128x128xf32>
      %c0_17 = arith.constant 0 : index
      %c0_18 = arith.constant 0 : index
      %24 = vector.load %arg6[%c0_17, %c0_18] : memref<1x128xf32, #tpu.memory_space<vmem>>, vector<1x128xf32>
      %25 = vector.broadcast %24 : vector<1x128xf32> to vector<128x128xf32>
      %26 = arith.addf %23, %25 : vector<128x128xf32>
      %c0_19 = arith.constant 0 : index
      %c0_20 = arith.constant 0 : index
      %27 = vector.load %arg7[%c0_19, %c0_20] : memref<128x128xf32, #tpu.memory_space<vmem>>, vector<128x128xf32>
      tpu.vector_store %arg7[%c0_19, %c0_20], %26 {strides = array<i32>} : memref<128x128xf32, #tpu.memory_space<vmem>>, vector<128x128xf32>,
    } else {
    }
    return
  }
  func.func @transform_0(%arg0: i32, %arg1: i32) -> (i32, i32) {
    %c0_i32 = arith.constant 0 : i32
    return %arg0, %arg1 : i32, i32
  }
  func.func @transform_1(%arg0: i32, %arg1: i32) -> (i32, i32) {
    %c0_i32 = arith.constant 0 : i32
    %c0_i32_0 = arith.constant 0 : i32
    %c0_i32_1 = arith.constant 0 : i32
    return %c0_i32, %c0_i32_0 : i32, i32
  }
  func.func @transform_2(%arg0: i32, %arg1: i32) -> (i32, i32) {
    %c0_i32 = arith.constant 0 : i32
    %c0_i32_0 = arith.constant 0 : i32
    %c0_i32_1 = arith.constant 0 : i32
    return %c0_i32, %c0_i32_0 : i32, i32
  }
  func.func @transform_3(%arg0: i32, %arg1: i32) -> (i32, i32) {
    %c0_i32 = arith.constant 0 : i32
    %c0_i32_0 = arith.constant 0 : i32
    %c0_i32_1 = arith.constant 0 : i32
    return %c0_i32, %c0_i32_0 : i32, i32
  }
  func.func @transform_4(%arg0: i32, %arg1: i32) -> (i32, i32) {
    %c0_i32 = arith.constant 0 : i32
    %c0_i32_0 = arith.constant 0 : i32
    %c0_i32_1 = arith.constant 0 : i32
    return %c0_i32, %c0_i32_0 : i32, i32
  }
  func.func @transform_5(%arg0: i32, %arg1: i32) -> (i32, i32) {
    %c0_i32 = arith.constant 0 : i32
    %c0_i32_0 = arith.constant 0 : i32
    return %arg0, %c0_i32 : i32, i32
  }
}

module attributes {stable_mosaic.version = 11 : i64} {
  func.func @gin_layer_kernel(%arg0: i32, %arg1: i32, %arg2: memref<128x128xbf16, #tpu.memory_space<vmem>>, %arg3: memref<128x128xbf16, #tpu.memory_space<vmem>>, %arg4: memref<1x128xf32, #tpu.memory_space<vmem>>, %arg5: memref<128x128xbf16, #tpu.memory_space<vmem>>, %arg6: memref<1x128xf32, #tpu.memory_space<vmem>>, %arg7: memref<128x128xbf16, #tpu.memory_space<vmem>>, %arg8: memref<128x128xbf16, #tpu.memory_space<vmem>>, %arg9: memref<128x128xf32, #tpu.memory_space<vmem>>) attributes {dimension_semantics = [#tpu.dimension_semantics<parallel>, #tpu.dimension_semantics<arbitrary>], iteration_bounds = array<i64: 1, 1>, scalar_prefetch = 0 : i64, scratch_operands = 1 : i64, tpu.core_type = #tpu.core_type<tc>, window_params = [{transform_indices = @transform_0, window_bounds = array<i64: 128, 128>}, {pipeline_mode = #tpu.pipeline_mode<synchronous>, transform_indices = @transform_1, window_bounds = array<i64: 128, 128>}, {pipeline_mode = #tpu.pipeline_mode<synchronous>, transform_indices = @transform_2, window_bounds = array<i64: 1, 128>}, {pipeline_mode = #tpu.pipeline_mode<synchronous>, transform_indices = @transform_3, window_bounds = array<i64: 128, 128>}, {pipeline_mode = #tpu.pipeline_mode<synchronous>, transform_indices = @transform_4, window_bounds = array<i64: 1, 128>}, {pipeline_mode = #tpu.pipeline_mode<synchronous>, transform_indices = @transform_5, window_bounds = array<i64: 128, 128>}, {transform_indices = @transform_6, window_bounds = array<i64: 128, 128>}]} {
    %c0_i32 = arith.constant 0 : i32
    %0 = arith.cmpi eq, %arg1, %c0_i32 : i32
    %1 = arith.extui %0 : i1 to i32
    %c0_i32_0 = arith.constant 0 : i32
    %2 = arith.cmpi ne, %1, %c0_i32_0 : i32
    scf.if %2 {
      %cst_9 = arith.constant 0.000000e+00 : f32
      %15 = vector.broadcast %cst_9 : f32 to vector<128x128xf32>
      %c0_10 = arith.constant 0 : index
      %c0_11 = arith.constant 0 : index
      %16 = vector.load %arg9[%c0_10, %c0_11] : memref<128x128xf32, #tpu.memory_space<vmem>>, vector<128x128xf32>
      tpu.vector_store %arg9[%c0_10, %c0_11], %15 {strides = array<i32>} : memref<128x128xf32, #tpu.memory_space<vmem>>, vector<128x128xf32>,
    } else {
    }
    %c128_i32 = arith.constant 128 : i32
    %3 = arith.muli %arg1, %c128_i32 : i32
    %4 = tpu.assume_multiple %3, 128 : i32
    %5 = arith.index_cast %4 : i32 to index
    %c0 = arith.constant 0 : index
    %6 = vector.load %arg3[%5, %c0] : memref<128x128xbf16, #tpu.memory_space<vmem>>, vector<128x128xbf16>
    %c0_1 = arith.constant 0 : index
    %c0_2 = arith.constant 0 : index
    %7 = vector.load %arg9[%c0_1, %c0_2] : memref<128x128xf32, #tpu.memory_space<vmem>>, vector<128x128xf32>
    %c0_3 = arith.constant 0 : index
    %c0_4 = arith.constant 0 : index
    %8 = vector.load %arg2[%c0_3, %c0_4] : memref<128x128xbf16, #tpu.memory_space<vmem>>, vector<128x128xbf16>
    %cst = arith.constant dense<0.000000e+00> : vector<128x128xf32>
    %9 = tpu.matmul %8, %6, %cst {dimension_numbers = #tpu.dot_dimension_numbers<[1], [0], [0], [1], [0, 0, 1, 1], [], []>} : vector<128x128xbf16>, vector<128x128xbf16>, vector<128x128xf32> -> vector<128x128xf32>
    %10 = arith.addf %7, %9 : vector<128x128xf32>
    %c0_5 = arith.constant 0 : index
    %c0_6 = arith.constant 0 : index
    %11 = vector.load %arg9[%c0_5, %c0_6] : memref<128x128xf32, #tpu.memory_space<vmem>>, vector<128x128xf32>
    tpu.vector_store %arg9[%c0_5, %c0_6], %10 {strides = array<i32>} : memref<128x128xf32, #tpu.memory_space<vmem>>, vector<128x128xf32>,
    %c0_i32_7 = arith.constant 0 : i32
    %12 = arith.cmpi eq, %arg1, %c0_i32_7 : i32
    %13 = arith.extui %12 : i1 to i32
    %c0_i32_8 = arith.constant 0 : i32
    %14 = arith.cmpi ne, %13, %c0_i32_8 : i32
    scf.if %14 {
      %c0_9 = arith.constant 0 : index
      %c0_10 = arith.constant 0 : index
      %15 = vector.load %arg9[%c0_9, %c0_10] : memref<128x128xf32, #tpu.memory_space<vmem>>, vector<128x128xf32>
      %c0_11 = arith.constant 0 : index
      %c0_12 = arith.constant 0 : index
      %16 = vector.load %arg4[%c0_11, %c0_12] : memref<1x128xf32, #tpu.memory_space<vmem>>, vector<1x128xf32>
      %17 = vector.broadcast %16 : vector<1x128xf32> to vector<128x128xf32>
      %18 = arith.addf %15, %17 : vector<128x128xf32>
      %cst_13 = arith.constant 0.000000e+00 : f32
      %19 = vector.broadcast %cst_13 : f32 to vector<128x128xf32>
      %20 = arith.maximumf %18, %19 : vector<128x128xf32>
      %21 = arith.truncf %20 : vector<128x128xf32> to vector<128x128xbf16>
      %c0_14 = arith.constant 0 : index
      %c0_15 = arith.constant 0 : index
      %22 = vector.load %arg5[%c0_14, %c0_15] : memref<128x128xbf16, #tpu.memory_space<vmem>>, vector<128x128xbf16>
      %cst_16 = arith.constant dense<0.000000e+00> : vector<128x128xf32>
      %23 = tpu.matmul %21, %22, %cst_16 {dimension_numbers = #tpu.dot_dimension_numbers<[1], [0], [0], [1], [0, 0, 1, 1], [], []>} : vector<128x128xbf16>, vector<128x128xbf16>, vector<128x128xf32> -> vector<128x128xf32>
      %c0_17 = arith.constant 0 : index
      %c0_18 = arith.constant 0 : index
      %24 = vector.load %arg6[%c0_17, %c0_18] : memref<1x128xf32, #tpu.memory_space<vmem>>, vector<1x128xf32>
      %25 = vector.broadcast %24 : vector<1x128xf32> to vector<128x128xf32>
      %26 = arith.addf %23, %25 : vector<128x128xf32>
      %cst_19 = arith.constant 0.000000e+00 : f32
      %27 = vector.broadcast %cst_19 : f32 to vector<128x128xf32>
      %28 = arith.maximumf %26, %27 : vector<128x128xf32>
      %29 = arith.truncf %28 : vector<128x128xf32> to vector<128x128xbf16>
      %c0_20 = arith.constant 0 : index
      %c0_21 = arith.constant 0 : index
      %30 = vector.load %arg7[%c0_20, %c0_21] : memref<128x128xbf16, #tpu.memory_space<vmem>>, vector<128x128xbf16>
      %cst_22 = arith.constant dense<0.000000e+00> : vector<128x128xf32>
      %31 = tpu.matmul %29, %30, %cst_22 {dimension_numbers = #tpu.dot_dimension_numbers<[1], [0], [0], [1], [0, 0, 1, 1], [], []>} : vector<128x128xbf16>, vector<128x128xbf16>, vector<128x128xf32> -> vector<128x128xf32>
      %32 = arith.truncf %31 : vector<128x128xf32> to vector<128x128xbf16>
      %c0_23 = arith.constant 0 : index
      %c0_24 = arith.constant 0 : index
      %33 = vector.load %arg8[%c0_23, %c0_24] : memref<128x128xbf16, #tpu.memory_space<vmem>>, vector<128x128xbf16>
      tpu.vector_store %arg8[%c0_23, %c0_24], %32 {strides = array<i32>} : memref<128x128xbf16, #tpu.memory_space<vmem>>, vector<128x128xbf16>,
    } else {
    }
    return
  }
  func.func @transform_0(%arg0: i32, %arg1: i32) -> (i32, i32) {
    %c0_i32 = arith.constant 0 : i32
    return %arg0, %arg1 : i32, i32
  }
  func.func @transform_1(%arg0: i32, %arg1: i32) -> (i32, i32) {
    %c0_i32 = arith.constant 0 : i32
    %c0_i32_0 = arith.constant 0 : i32
    %c0_i32_1 = arith.constant 0 : i32
    return %c0_i32, %c0_i32_0 : i32, i32
  }
  func.func @transform_2(%arg0: i32, %arg1: i32) -> (i32, i32) {
    %c0_i32 = arith.constant 0 : i32
    %c0_i32_0 = arith.constant 0 : i32
    %c0_i32_1 = arith.constant 0 : i32
    return %c0_i32, %c0_i32_0 : i32, i32
  }
  func.func @transform_3(%arg0: i32, %arg1: i32) -> (i32, i32) {
    %c0_i32 = arith.constant 0 : i32
    %c0_i32_0 = arith.constant 0 : i32
    %c0_i32_1 = arith.constant 0 : i32
    return %c0_i32, %c0_i32_0 : i32, i32
  }
  func.func @transform_4(%arg0: i32, %arg1: i32) -> (i32, i32) {
    %c0_i32 = arith.constant 0 : i32
    %c0_i32_0 = arith.constant 0 : i32
    %c0_i32_1 = arith.constant 0 : i32
    return %c0_i32, %c0_i32_0 : i32, i32
  }
  func.func @transform_5(%arg0: i32, %arg1: i32) -> (i32, i32) {
    %c0_i32 = arith.constant 0 : i32
    %c0_i32_0 = arith.constant 0 : i32
    %c0_i32_1 = arith.constant 0 : i32
    return %c0_i32, %c0_i32_0 : i32, i32
  }
  func.func @transform_6(%arg0: i32, %arg1: i32) -> (i32, i32) {
    %c0_i32 = arith.constant 0 : i32
    %c0_i32_0 = arith.constant 0 : i32
    return %arg0, %c0_i32 : i32, i32
  }
}

</mosaic_0001>

<bundles_post_ra>
// kernel: gin_net_forward.3
= control target key start
LH: loop header
LB: loop body
LE: loop exit
PB: predicated region body
PF: predicated region fallthrough
CT: control target
= control target key end

     0   :  { %s877_s1 = inlined_call_operand.vmem [shape: bf16[128,128], index: 1, kind: input, shape index: {}]   ;;  %s878_s0 = inlined_call_operand.vmem [shape: bf16[128,128], index: 0, kind: input, shape index: {}]   ;;  %s879_s3 = inlined_call_operand.vmem [shape: bf16[128,128], index: 3, kind: input, shape index: {}]   ;;  %s880_s2 = inlined_call_operand.vmem [shape: f32[1,128], index: 2, kind: input, shape index: {}]   ;;  %s881_s4 = inlined_call_operand.vmem [shape: f32[1,128], index: 4, kind: input, shape index: {}]   ;;  %s882_s5 = inlined_call_operand.vmem [shape: f32[128,128], index: 5, kind: output, shape index: {}]  }
   0x1   :  { %v697_v0 = vld [vmem:[%s877_s1 + $0x38] sm:$0xff]   ;;  %v698_v1 = vld [vmem:[%s877_s1 + $0x30] sm:$0xff]   ;;  %v699_v2 = vld [vmem:[%s877_s1 + $0x28] sm:$0xff]  }
   0x2   :  { %633 = vmatprep.subr.bf16.mxu0 %v697_v0  ;;  %v700_v3 = vld [vmem:[%s877_s1 + $0x20] sm:$0xff]   ;;  %v701_v5 = vld [vmem:[%s877_s1 + $0x18] sm:$0xff]   ;;  %v702_v6 = vld [vmem:[%s877_s1 + $0x10] sm:$0xff]  }
   0x3   :  { %634 = vmatpush3.bf16.msra.mxu0 %v697_v0  ;;  %v705_v4 = vld [vmem:[%s878_s0] sm:$0xff]   ;;  %v713_v7 = vld [vmem:[%s879_s3 + $0x38] sm:$0xff]   ;;  %v714_v8 = vld [vmem:[%s879_s3 + $0x30] sm:$0xff]  }
   0x4   :  { %635 = vmatprep.subr.bf16.mxu0 %v698_v1  ;;  %649 = vmatprep.mubr.bf16.mxu0 %v705_v4  ;;  %v703_v9 = vld [vmem:[%s877_s1 + $0x8] sm:$0xff]   ;;  %v704_v11 = vld [vmem:[%s877_s1] sm:$0xff]   ;;  %v717_v13 = vld [vmem:[%s879_s3 + $0x18] sm:$0xff]  }
   0x5   :  { %665 = vmatprep.subr.bf16.mxu1 %v713_v7  ;;  %v715_v10 = vld [vmem:[%s879_s3 + $0x28] sm:$0xff]   ;;  %v716_v12 = vld [vmem:[%s879_s3 + $0x20] sm:$0xff]   ;;  %v707_v15 = vld [vmem:[%s878_s0 + $0x10] sm:$0xff]  }
   0x6   :  { %666 = vmatpush3.bf16.msra.mxu1 %v713_v7  ;;  %v706_v14 = vld [vmem:[%s878_s0 + $0x8] sm:$0xff]   ;;  %v708_v16 = vld [vmem:[%s878_s0 + $0x18] sm:$0xff]   ;;  %v709_v17 = vld [vmem:[%s878_s0 + $0x20] sm:$0xff]  }
   0x7   :  { %636 = vmatpush3.bf16.msra.mxu0 %v698_v1  ;;  %667 = vmatprep.subr.bf16.mxu1 %v714_v8  ;;  %v710_v18 = vld [vmem:[%s878_s0 + $0x28] sm:$0xff]   ;;  %v711_v19 = vld [vmem:[%s878_s0 + $0x30] sm:$0xff]   ;;  %v712_v20 = vld [vmem:[%s878_s0 + $0x38] sm:$0xff]  }
   0x8   :  { %637 = vmatprep.subr.bf16.mxu0 %v699_v2  ;;  %v718_v21 = vld [vmem:[%s879_s3 + $0x10] sm:$0xff]   ;;  %v719_v22 = vld [vmem:[%s879_s3 + $0x8] sm:$0xff]   ;;  %v720_v23 = vld [vmem:[%s879_s3] sm:$0xff]  }
   0x9   :  { %v591_v26 = vld [vmem:[%s880_s2] ss:$0 sm:$0xff] }
   0xa   :  { %668 = vmatpush3.bf16.msra.mxu1 %v714_v8 }
   0xb   :  { %638 = vmatpush3.bf16.msra.mxu0 %v699_v2  ;;  %669 = vmatprep.subr.bf16.mxu1 %v715_v10 }
   0xc   :  { %639 = vmatprep.subr.bf16.mxu0 %v700_v3 }
   0xe   :  { %670 = vmatpush3.bf16.msra.mxu1 %v715_v10 }
   0xf   :  { %640 = vmatpush3.bf16.msra.mxu0 %v700_v3  ;;  %671 = vmatprep.subr.bf16.mxu1 %v716_v12 }
  0x10   :  { %641 = vmatprep.subr.bf16.mxu0 %v701_v5 }
  0x12   :  { %672 = vmatpush3.bf16.msra.mxu1 %v716_v12 }
  0x13   :  { %642 = vmatpush3.bf16.msra.mxu0 %v701_v5  ;;  %673 = vmatprep.subr.bf16.mxu1 %v717_v13 }
  0x14   :  { %643 = vmatprep.subr.bf16.mxu0 %v702_v6 }
  0x16   :  { %674 = vmatpush3.bf16.msra.mxu1 %v717_v13 }
  0x17   :  { %644 = vmatpush3.bf16.msra.mxu0 %v702_v6  ;;  %675 = vmatprep.subr.bf16.mxu1 %v718_v21 }
  0x18   :  { %645 = vmatprep.subr.bf16.mxu0 %v703_v9 }
  0x1a   :  { %676 = vmatpush3.bf16.msra.mxu1 %v718_v21 }
  0x1b   :  { %646 = vmatpush3.bf16.msra.mxu0 %v703_v9  ;;  %677 = vmatprep.subr.bf16.mxu1 %v719_v22 }
  0x1c   :  { %647 = vmatprep.subr.bf16.mxu0 %v704_v11 }
  0x1e   :  { %678 = vmatpush3.bf16.msra.mxu1 %v719_v22 }
  0x1f   :  { %648 = vmatpush3.bf16.msra.mxu0 %v704_v11  ;;  %679 = vmatprep.subr.bf16.mxu1 %v720_v23 }
  0x22   :  { %650 = vmatmul.mubr.bf16.vlgmr.msra.gmra.mxu0 %v706_v14  ;;  %680 = vmatpush3.bf16.msra.mxu1 %v720_v23 }
  0x23   :  { %653 = vmatprep.mubr.bf16.mxu0 %v707_v15 }
  0x2a   :  { %654 = vmatmul.mubr.bf16.gmra.mxu0 %v708_v16 }
  0x2b   :  { %657 = vmatprep.mubr.bf16.mxu0 %v709_v17  ;;  %v592_v17 = vld [vmem:[%s881_s4] ss:$0 sm:$0xff] }
  0x32   :  { %658 = vmatmul.mubr.bf16.gmra.mxu0 %v710_v18 }
  0x33   :  { %661 = vmatprep.mubr.bf16.mxu0 %v711_v19 }
  0x3a   :  { %662 = vmatmul.mubr.bf16.gmra.mxu0 %v712_v20 }
  0xe2   :  { %v651_v24 = vpop.f32.mrf.mxu0 }
  0xe3   :  { %v347_v30 = vadd.f32 %v651_v24, %v591_v26 }
  0xe4   :  { %v224_v25 = vpop.f32.mrf.mxu0 }
  0xe5   :  { %v345_v28 = vadd.f32 %v591_v26, %v224_v25  ;;  %v363_v37 = vmax.f32 %v347_v30, 0.0 }
  0xe6   :  { %v652_v27 = vpop.f32.mrf.mxu0 }
  0xe7   :  { %v348_v29 = vadd.f32 %v652_v27, %v591_v26  ;;  %v361_v35 = vmax.f32 %v345_v28, 0.0 }
  0xe8   :  { %v227_v31 = vpop.f32.mrf.mxu0 }
  0xe9   :  { %v346_v32 = vadd.f32 %v591_v26, %v227_v31  ;;  %v364_v33 = vmax.f32 %v348_v29, 0.0 }
  0xea   :  { %v655_v34 = vpop.f32.mrf.mxu0 }
  0xeb   :  { %v362_v36 = vmax.f32 %v346_v32, 0.0  ;;  %v378_v40 = vpack.c.bf16 %v364_v33, %v363_v37  ;;  %v351_v44 = vadd.f32 %v655_v34, %v591_v26 }
  0xec   :  { %v240_v38 = vpop.f32.mrf.mxu0 }
  0xed   :  { %v377_v39 = vpack.c.bf16 %v362_v36, %v361_v35  ;;  %v349_v42 = vadd.f32 %v591_v26, %v240_v38  ;;  %v367_v51 = vmax.f32 %v351_v44, 0.0 }
  0xee   :  { %v656_v41 = vpop.f32.mrf.mxu0 }
  0xef   :  { %v352_v43 = vadd.f32 %v656_v41, %v591_v26  ;;  %681 = vmatprep.mubr.bf16.mxu1 %v377_v39  ;;  %v365_v49 = vmax.f32 %v349_v42, 0.0 }
  0xf0   :  { %v243_v45 = vpop.f32.mrf.mxu0  ;;  %682 = vmatmul.mubr.bf16.vlgmr.msra.gmra.mxu1 %v378_v40 }
  0xf1   :  { %v350_v46 = vadd.f32 %v591_v26, %v243_v45  ;;  %v368_v47 = vmax.f32 %v352_v43, 0.0 }
  0xf2   :  { %v659_v48 = vpop.f32.mrf.mxu0 }
  0xf3   :  { %v366_v50 = vmax.f32 %v350_v46, 0.0  ;;  %v380_v54 = vpack.c.bf16 %v368_v47, %v367_v51  ;;  %v355_v58 = vadd.f32 %v659_v48, %v591_v26 }
  0xf4   :  { %v256_v52 = vpop.f32.mrf.mxu0 }
  0xf5   :  { %v379_v53 = vpack.c.bf16 %v366_v50, %v365_v49  ;;  %v353_v56 = vadd.f32 %v591_v26, %v256_v52  ;;  %v371_v1 = vmax.f32 %v355_v58, 0.0 }
  0xf6   :  { %v660_v55 = vpop.f32.mrf.mxu0 }
  0xf7   :  { %v356_v57 = vadd.f32 %v660_v55, %v591_v26  ;;  %685 = vmatprep.mubr.bf16.mxu1 %v379_v53  ;;  %v369_v63 = vmax.f32 %v353_v56, 0.0 }
  0xf8   :  { %v259_v59 = vpop.f32.mrf.mxu0  ;;  %686 = vmatmul.mubr.bf16.gmra.mxu1 %v380_v54 }
  0xf9   :  { %v354_v60 = vadd.f32 %v591_v26, %v259_v59  ;;  %v372_v61 = vmax.f32 %v356_v57, 0.0 }
  0xfa   :  { %v663_v62 = vpop.f32.mrf.mxu0 }
  0xfb   :  { %v370_v0 = vmax.f32 %v354_v60, 0.0  ;;  %v382_v4 = vpack.c.bf16 %v372_v61, %v371_v1  ;;  %v359_v8 = vadd.f32 %v663_v62, %v591_v26 }
  0xfc   :  { %v272_v2 = vpop.f32.mrf.mxu0 }
  0xfd   :  { %v381_v3 = vpack.c.bf16 %v370_v0, %v369_v63  ;;  %v357_v6 = vadd.f32 %v591_v26, %v272_v2  ;;  %v375_v14 = vmax.f32 %v359_v8, 0.0 }
  0xfe   :  { %v664_v5 = vpop.f32.mrf.mxu0 }
  0xff   :  { %v360_v7 = vadd.f32 %v664_v5, %v591_v26  ;;  %689 = vmatprep.mubr.bf16.mxu1 %v381_v3  ;;  %v373_v12 = vmax.f32 %v357_v6, 0.0 }
 0x100   :  { %v275_v9 = vpop.f32.mrf.mxu0  ;;  %690 = vmatmul.mubr.bf16.gmra.mxu1 %v382_v4 }
 0x101   :  { %v358_v10 = vadd.f32 %v591_v26, %v275_v9  ;;  %v376_v11 = vmax.f32 %v360_v7, 0.0 }
 0x103   :  { %v374_v13 = vmax.f32 %v358_v10, 0.0  ;;  %v384_v16 = vpack.c.bf16 %v376_v11, %v375_v14 }
 0x105   :  { %v383_v15 = vpack.c.bf16 %v374_v13, %v373_v12 }
 0x107   :  { %693 = vmatprep.mubr.bf16.mxu1 %v383_v15 }
 0x108   :  { %694 = vmatmul.mubr.bf16.gmra.mxu1 %v384_v16 }
 0x1b0   :  { %v683_v18 = vpop.f32.mrf.mxu1 }
 0x1b1   :  { %v499_v19 = vadd.f32 %v683_v18, %v592_v17 }
 0x1b2   :  { %v490_v20 = vpop.f32.mrf.mxu1 }
 0x1b3   :  { %555 = vst [vmem:[%s882_s5 + $0x10] sm:$0xff] %v499_v19  ;;  %v491_v21 = vadd.f32 %v592_v17, %v490_v20 }
 0x1b4   :  { %v684_v22 = vpop.f32.mrf.mxu1 }
 0x1b5   :  { %553 = vst [vmem:[%s882_s5] sm:$0xff] %v491_v21  ;;  %v502_v23 = vadd.f32 %v684_v22, %v592_v17 }
 0x1b6   :  { %v493_v24 = vpop.f32.mrf.mxu1 }
 0x1b7   :  { %556 = vst [vmem:[%s882_s5 + $0x18] sm:$0xff] %v502_v23  ;;  %v494_v25 = vadd.f32 %v592_v17, %v493_v24 }
 0x1b8   :  { %v687_v26 = vpop.f32.mrf.mxu1 }
 0x1b9   :  { %554 = vst [vmem:[%s882_s5 + $0x8] sm:$0xff] %v494_v25  ;;  %v515_v27 = vadd.f32 %v687_v26, %v592_v17 }
 0x1ba   :  { %v506_v28 = vpop.f32.mrf.mxu1 }
 0x1bb   :  { %559 = vst [vmem:[%s882_s5 + $0x30] sm:$0xff] %v515_v27  ;;  %v507_v29 = vadd.f32 %v592_v17, %v506_v28 }
 0x1bc   :  { %v688_v30 = vpop.f32.mrf.mxu1 }
 0x1bd   :  { %557 = vst [vmem:[%s882_s5 + $0x20] sm:$0xff] %v507_v29  ;;  %v518_v31 = vadd.f32 %v688_v30, %v592_v17 }
 0x1be   :  { %v509_v32 = vpop.f32.mrf.mxu1 }
 0x1bf   :  { %560 = vst [vmem:[%s882_s5 + $0x38] sm:$0xff] %v518_v31  ;;  %v510_v33 = vadd.f32 %v592_v17, %v509_v32 }
 0x1c0   :  { %v691_v34 = vpop.f32.mrf.mxu1 }
 0x1c1   :  { %558 = vst [vmem:[%s882_s5 + $0x28] sm:$0xff] %v510_v33  ;;  %v531_v35 = vadd.f32 %v691_v34, %v592_v17 }
 0x1c2   :  { %v522_v36 = vpop.f32.mrf.mxu1 }
 0x1c3   :  { %563 = vst [vmem:[%s882_s5 + $0x50] sm:$0xff] %v531_v35  ;;  %v523_v37 = vadd.f32 %v592_v17, %v522_v36 }
 0x1c4   :  { %v692_v38 = vpop.f32.mrf.mxu1 }
 0x1c5   :  { %561 = vst [vmem:[%s882_s5 + $0x40] sm:$0xff] %v523_v37  ;;  %v534_v39 = vadd.f32 %v692_v38, %v592_v17 }
 0x1c6   :  { %v525_v40 = vpop.f32.mrf.mxu1 }
 0x1c7   :  { %564 = vst [vmem:[%s882_s5 + $0x58] sm:$0xff] %v534_v39  ;;  %v526_v41 = vadd.f32 %v592_v17, %v525_v40 }
 0x1c8   :  { %v695_v42 = vpop.f32.mrf.mxu1 }
 0x1c9   :  { %562 = vst [vmem:[%s882_s5 + $0x48] sm:$0xff] %v526_v41  ;;  %v547_v43 = vadd.f32 %v695_v42, %v592_v17 }
 0x1ca   :  { %v538_v44 = vpop.f32.mrf.mxu1 }
 0x1cb   :  { %567 = vst [vmem:[%s882_s5 + $0x70] sm:$0xff] %v547_v43  ;;  %v539_v45 = vadd.f32 %v592_v17, %v538_v44 }
 0x1cc   :  { %v696_v46 = vpop.f32.mrf.mxu1 }
 0x1cd   :  { %565 = vst [vmem:[%s882_s5 + $0x60] sm:$0xff] %v539_v45  ;;  %v550_v47 = vadd.f32 %v696_v46, %v592_v17 }
 0x1ce   :  { %v541_v48 = vpop.f32.mrf.mxu1 }
 0x1cf   :  { %568 = vst [vmem:[%s882_s5 + $0x78] sm:$0xff] %v550_v47  ;;  %v542_v49 = vadd.f32 %v592_v17, %v541_v48 }
 0x1d1   :  { %566 = vst [vmem:[%s882_s5 + $0x68] sm:$0xff] %v542_v49 }

// kernel: gin_net_forward.2
= control target key start
LH: loop header
LB: loop body
LE: loop exit
PB: predicated region body
PF: predicated region fallthrough
CT: control target
= control target key end

     0   :  { %s1299_s1 = inlined_call_operand.vmem [shape: bf16[128,128], index: 1, kind: input, shape index: {}]   ;;  %s1300_s0 = inlined_call_operand.vmem [shape: bf16[128,128], index: 0, kind: input, shape index: {}]   ;;  %s1301_s3 = inlined_call_operand.vmem [shape: bf16[128,128], index: 3, kind: input, shape index: {}]   ;;  %s1302_s5 = inlined_call_operand.vmem [shape: bf16[128,128], index: 5, kind: input, shape index: {}]   ;;  %s1303_s2 = inlined_call_operand.vmem [shape: f32[1,128], index: 2, kind: input, shape index: {}]   ;;  %s1304_s4 = inlined_call_operand.vmem [shape: f32[1,128], index: 4, kind: input, shape index: {}]   ;;  %s1305_s6 = inlined_call_operand.vmem [shape: bf16[128,128], index: 6, kind: output, shape index: {}]  }
   0x1   :  { %v1100_v0 = vld [vmem:[%s1299_s1 + $0x38] sm:$0xff]   ;;  %v1101_v1 = vld [vmem:[%s1299_s1 + $0x30] sm:$0xff]   ;;  %v1102_v2 = vld [vmem:[%s1299_s1 + $0x28] sm:$0xff]  }
   0x2   :  { %988 = vmatprep.subr.bf16.mxu0 %v1100_v0  ;;  %v1103_v3 = vld [vmem:[%s1299_s1 + $0x20] sm:$0xff]   ;;  %v1104_v5 = vld [vmem:[%s1299_s1 + $0x18] sm:$0xff]   ;;  %v1105_v6 = vld [vmem:[%s1299_s1 + $0x10] sm:$0xff]  }
   0x3   :  { %989 = vmatpush3.bf16.msra.mxu0 %v1100_v0  ;;  %v1108_v4 = vld [vmem:[%s1300_s0] sm:$0xff]   ;;  %v1116_v7 = vld [vmem:[%s1301_s3 + $0x38] sm:$0xff]   ;;  %v1117_v8 = vld [vmem:[%s1301_s3 + $0x30] sm:$0xff]  }
   0x4   :  { %990 = vmatprep.subr.bf16.mxu0 %v1101_v1  ;;  %1004 = vmatprep.mubr.bf16.mxu0 %v1108_v4  ;;  %v1106_v9 = vld [vmem:[%s1299_s1 + $0x8] sm:$0xff]   ;;  %v1107_v11 = vld [vmem:[%s1299_s1] sm:$0xff]   ;;  %v1120_v13 = vld [vmem:[%s1301_s3 + $0x18] sm:$0xff]  }
   0x5   :  { %1020 = vmatprep.subr.bf16.mxu1 %v1116_v7  ;;  %v1118_v10 = vld [vmem:[%s1301_s3 + $0x28] sm:$0xff]   ;;  %v1119_v12 = vld [vmem:[%s1301_s3 + $0x20] sm:$0xff]   ;;  %v1110_v15 = vld [vmem:[%s1300_s0 + $0x10] sm:$0xff]  }
   0x6   :  { %1021 = vmatpush3.bf16.msra.mxu1 %v1116_v7  ;;  %v1109_v14 = vld [vmem:[%s1300_s0 + $0x8] sm:$0xff]   ;;  %v1111_v16 = vld [vmem:[%s1300_s0 + $0x18] sm:$0xff]   ;;  %v1112_v17 = vld [vmem:[%s1300_s0 + $0x20] sm:$0xff]  }
   0x7   :  { %991 = vmatpush3.bf16.msra.mxu0 %v1101_v1  ;;  %1022 = vmatprep.subr.bf16.mxu1 %v1117_v8  ;;  %v1113_v18 = vld [vmem:[%s1300_s0 + $0x28] sm:$0xff]   ;;  %v1114_v19 = vld [vmem:[%s1300_s0 + $0x30] sm:$0xff]   ;;  %v1115_v20 = vld [vmem:[%s1300_s0 + $0x38] sm:$0xff]  }
   0x8   :  { %992 = vmatprep.subr.bf16.mxu0 %v1102_v2  ;;  %v1121_v21 = vld [vmem:[%s1301_s3 + $0x10] sm:$0xff]   ;;  %v1122_v22 = vld [vmem:[%s1301_s3 + $0x8] sm:$0xff]   ;;  %v1123_v23 = vld [vmem:[%s1301_s3] sm:$0xff]  }
   0x9   :  { %v1124_v24 = vld [vmem:[%s1302_s5 + $0x38] sm:$0xff]   ;;  %v1125_v25 = vld [vmem:[%s1302_s5 + $0x30] sm:$0xff]   ;;  %v1126_v26 = vld [vmem:[%s1302_s5 + $0x28] sm:$0xff]  }
   0xa   :  { %1023 = vmatpush3.bf16.msra.mxu1 %v1117_v8  ;;  %v1127_v27 = vld [vmem:[%s1302_s5 + $0x20] sm:$0xff]   ;;  %v1254_v28 = vld [vmem:[%s1302_s5 + $0x18] sm:$0xff]  }
   0xb   :  { %993 = vmatpush3.bf16.msra.mxu0 %v1102_v2  ;;  %1024 = vmatprep.subr.bf16.mxu1 %v1118_v10  ;;  %v843_v31 = vld [vmem:[%s1303_s2] ss:$0 sm:$0xff] }
   0xc   :  { %994 = vmatprep.subr.bf16.mxu0 %v1103_v3 }
   0xe   :  { %1025 = vmatpush3.bf16.msra.mxu1 %v1118_v10 }
   0xf   :  { %995 = vmatpush3.bf16.msra.mxu0 %v1103_v3  ;;  %1026 = vmatprep.subr.bf16.mxu1 %v1119_v12 }
  0x10   :  { %996 = vmatprep.subr.bf16.mxu0 %v1104_v5 }
  0x12   :  { %1027 = vmatpush3.bf16.msra.mxu1 %v1119_v12 }
  0x13   :  { %997 = vmatpush3.bf16.msra.mxu0 %v1104_v5  ;;  %1028 = vmatprep.subr.bf16.mxu1 %v1120_v13 }
  0x14   :  { %998 = vmatprep.subr.bf16.mxu0 %v1105_v6 }
  0x16   :  { %1029 = vmatpush3.bf16.msra.mxu1 %v1120_v13 }
  0x17   :  { %999 = vmatpush3.bf16.msra.mxu0 %v1105_v6  ;;  %1030 = vmatprep.subr.bf16.mxu1 %v1121_v21 }
  0x18   :  { %1000 = vmatprep.subr.bf16.mxu0 %v1106_v9 }
  0x1a   :  { %1031 = vmatpush3.bf16.msra.mxu1 %v1121_v21 }
  0x1b   :  { %1001 = vmatpush3.bf16.msra.mxu0 %v1106_v9  ;;  %1032 = vmatprep.subr.bf16.mxu1 %v1122_v22 }
  0x1c   :  { %1002 = vmatprep.subr.bf16.mxu0 %v1107_v11 }
  0x1e   :  { %1033 = vmatpush3.bf16.msra.mxu1 %v1122_v22  ;;  %v1129_v22 = vld [vmem:[%s1302_s5 + $0x10] sm:$0xff]  }
  0x1f   :  { %1003 = vmatpush3.bf16.msra.mxu0 %v1107_v11  ;;  %1034 = vmatprep.subr.bf16.mxu1 %v1123_v23 }
  0x20   :  { %1052 = vmatprep.subr.bf16.mxu0 %v1124_v24 }
  0x22   :  { %1005 = vmatmul.mubr.bf16.vlgmr.msra.gmra.mxu0 %v1109_v14  ;;  %1035 = vmatpush3.bf16.msra.mxu1 %v1123_v23  ;;  %v1130_v23 = vld [vmem:[%s1302_s5 + $0x8] sm:$0xff]  }
  0x23   :  { %1008 = vmatprep.mubr.bf16.mxu0 %v1110_v15  ;;  %1084 = vmatprep.subr.bf16.mxu1 %v1124_v24 }
  0x24   :  { %1053 = vmatpush3.bf16.msra.mxu0 %v1124_v24 }
  0x25   :  { %1054 = vmatprep.subr.bf16.mxu0 %v1125_v25 }
  0x28   :  { %1055 = vmatpush3.bf16.msra.mxu0 %v1125_v25 }
  0x29   :  { %1056 = vmatprep.subr.bf16.mxu0 %v1126_v26 }
  0x2a   :  { %1009 = vmatmul.mubr.bf16.gmra.mxu0 %v1111_v16 }
  0x2b   :  { %1012 = vmatprep.mubr.bf16.mxu0 %v1112_v17 }
  0x2c   :  { %1057 = vmatpush3.bf16.msra.mxu0 %v1126_v26 }
  0x2d   :  { %1058 = vmatprep.subr.bf16.mxu0 %v1127_v27 }
  0x30   :  { %1059 = vmatpush3.bf16.msra.mxu0 %v1127_v27 }
  0x31   :  { %1060 = vmatprep.subr.bf16.mxu0 %v1254_v28 }
  0x32   :  { %1013 = vmatmul.mubr.bf16.gmra.mxu0 %v1113_v18 }
  0x33   :  { %1016 = vmatprep.mubr.bf16.mxu0 %v1114_v19 }
  0x34   :  { %1061 = vmatpush3.bf16.msra.mxu0 %v1254_v28 }
  0x35   :  { %1062 = vmatprep.subr.bf16.mxu0 %v1129_v22 }
  0x38   :  { %1063 = vmatpush3.bf16.msra.mxu0 %v1129_v22 }
  0x39   :  { %1064 = vmatprep.subr.bf16.mxu0 %v1130_v23 }
  0x3a   :  { %1017 = vmatmul.mubr.bf16.gmra.mxu0 %v1115_v20 }
  0x3c   :  { %1065 = vmatpush3.bf16.msra.mxu0 %v1130_v23 }
  0xe2   :  { %v1006_v29 = vpop.f32.mrf.mxu0 }
  0xe3   :  { %v350_v35 = vadd.f32 %v1006_v29, %v843_v31 }
  0xe4   :  { %v227_v30 = vpop.f32.mrf.mxu0 }
  0xe5   :  { %v348_v33 = vadd.f32 %v843_v31, %v227_v30  ;;  %v366_v42 = vmax.f32 %v350_v35, 0.0 }
  0xe6   :  { %v1007_v32 = vpop.f32.mrf.mxu0 }
  0xe7   :  { %v351_v34 = vadd.f32 %v1007_v32, %v843_v31  ;;  %v364_v40 = vmax.f32 %v348_v33, 0.0 }
  0xe8   :  { %v230_v36 = vpop.f32.mrf.mxu0 }
  0xe9   :  { %v349_v37 = vadd.f32 %v843_v31, %v230_v36  ;;  %v367_v38 = vmax.f32 %v351_v34, 0.0 }
  0xea   :  { %v1010_v39 = vpop.f32.mrf.mxu0 }
  0xeb   :  { %v365_v41 = vmax.f32 %v349_v37, 0.0  ;;  %v381_v45 = vpack.c.bf16 %v367_v38, %v366_v42  ;;  %v354_v49 = vadd.f32 %v1010_v39, %v843_v31 }
  0xec   :  { %v243_v43 = vpop.f32.mrf.mxu0 }
  0xed   :  { %v380_v44 = vpack.c.bf16 %v365_v41, %v364_v40  ;;  %v352_v47 = vadd.f32 %v843_v31, %v243_v43  ;;  %v370_v56 = vmax.f32 %v354_v49, 0.0 }
  0xee   :  { %v1011_v46 = vpop.f32.mrf.mxu0 }
  0xef   :  { %v355_v48 = vadd.f32 %v1011_v46, %v843_v31  ;;  %1036 = vmatprep.mubr.bf16.mxu1 %v380_v44  ;;  %v368_v54 = vmax.f32 %v352_v47, 0.0 }
  0xf0   :  { %v246_v50 = vpop.f32.mrf.mxu0  ;;  %1037 = vmatmul.mubr.bf16.vlgmr.msra.gmra.mxu1 %v381_v45 }
  0xf1   :  { %v353_v51 = vadd.f32 %v843_v31, %v246_v50  ;;  %1092 = vmatpush3.bf16.msra.mxu1 %v1124_v24  ;;  %v371_v52 = vmax.f32 %v355_v48, 0.0  ;;  %v1131_v24 = vld [vmem:[%s1302_s5] sm:$0xff]  }
  0xf2   :  { %v1014_v53 = vpop.f32.mrf.mxu0  ;;  %1085 = vmatprep.subr.bf16.mxu1 %v1125_v25  ;;  %1066 = vmatprep.subr.bf16.mxu0 %v1131_v24 }
  0xf3   :  { %v369_v55 = vmax.f32 %v353_v51, 0.0  ;;  %v383_v59 = vpack.c.bf16 %v371_v52, %v370_v56  ;;  %v358_v63 = vadd.f32 %v1014_v53, %v843_v31  ;;  %1067 = vmatpush3.bf16.msra.mxu0 %v1131_v24 }
  0xf4   :  { %v259_v57 = vpop.f32.mrf.mxu0 }
  0xf5   :  { %v382_v58 = vpack.c.bf16 %v369_v55, %v368_v54  ;;  %1093 = vmatpush3.bf16.msra.mxu1 %v1125_v25  ;;  %v356_v61 = vadd.f32 %v843_v31, %v259_v57  ;;  %v374_v6 = vmax.f32 %v358_v63, 0.0 }
  0xf6   :  { %v1015_v60 = vpop.f32.mrf.mxu0  ;;  %1086 = vmatprep.subr.bf16.mxu1 %v1126_v26 }
  0xf7   :  { %v359_v62 = vadd.f32 %v1015_v60, %v843_v31  ;;  %1040 = vmatprep.mubr.bf16.mxu1 %v382_v58  ;;  %v372_v4 = vmax.f32 %v356_v61, 0.0 }
  0xf8   :  { %v262_v0 = vpop.f32.mrf.mxu0  ;;  %1041 = vmatmul.mubr.bf16.gmra.mxu1 %v383_v59 }
  0xf9   :  { %v357_v1 = vadd.f32 %v843_v31, %v262_v0  ;;  %1094 = vmatpush3.bf16.msra.mxu1 %v1126_v26  ;;  %v375_v2 = vmax.f32 %v359_v62, 0.0 }
  0xfa   :  { %v1018_v3 = vpop.f32.mrf.mxu0  ;;  %1087 = vmatprep.subr.bf16.mxu1 %v1127_v27 }
  0xfb   :  { %v373_v5 = vmax.f32 %v357_v1, 0.0  ;;  %v385_v9 = vpack.c.bf16 %v375_v2, %v374_v6  ;;  %v362_v13 = vadd.f32 %v1018_v3, %v843_v31 }
  0xfc   :  { %v275_v7 = vpop.f32.mrf.mxu0 }
  0xfd   :  { %v384_v8 = vpack.c.bf16 %v373_v5, %v372_v4  ;;  %1095 = vmatpush3.bf16.msra.mxu1 %v1127_v27  ;;  %v360_v11 = vadd.f32 %v843_v31, %v275_v7  ;;  %v378_v19 = vmax.f32 %v362_v13, 0.0  ;;  %v844_v27 = vld [vmem:[%s1304_s4] ss:$0 sm:$0xff] }
  0xfe   :  { %v1019_v10 = vpop.f32.mrf.mxu0  ;;  %1088 = vmatprep.subr.bf16.mxu1 %v1254_v28 }
  0xff   :  { %v363_v12 = vadd.f32 %v1019_v10, %v843_v31  ;;  %1044 = vmatprep.mubr.bf16.mxu1 %v384_v8  ;;  %v376_v17 = vmax.f32 %v360_v11, 0.0 }
 0x100   :  { %v278_v14 = vpop.f32.mrf.mxu0  ;;  %1045 = vmatmul.mubr.bf16.gmra.mxu1 %v385_v9 }
 0x101   :  { %v361_v15 = vadd.f32 %v843_v31, %v278_v14  ;;  %1096 = vmatpush3.bf16.msra.mxu1 %v1254_v28  ;;  %v379_v16 = vmax.f32 %v363_v12, 0.0 }
 0x102   :  { %1089 = vmatprep.subr.bf16.mxu1 %v1129_v22 }
 0x103   :  { %v377_v18 = vmax.f32 %v361_v15, 0.0  ;;  %v387_v21 = vpack.c.bf16 %v379_v16, %v378_v19 }
 0x105   :  { %v386_v20 = vpack.c.bf16 %v377_v18, %v376_v17  ;;  %1097 = vmatpush3.bf16.msra.mxu1 %v1129_v22 }
 0x106   :  { %1090 = vmatprep.subr.bf16.mxu1 %v1130_v23 }
 0x107   :  { %1048 = vmatprep.mubr.bf16.mxu1 %v386_v20 }
 0x108   :  { %1049 = vmatmul.mubr.bf16.gmra.mxu1 %v387_v21 }
 0x109   :  { %1098 = vmatpush3.bf16.msra.mxu1 %v1130_v23 }
 0x10a   :  { %1091 = vmatprep.subr.bf16.mxu1 %v1131_v24 }
 0x10d   :  { %1099 = vmatpush3.bf16.msra.mxu1 %v1131_v24 }
 0x1b0   :  { %v1038_v25 = vpop.f32.mrf.mxu1 }
 0x1b1   :  { %v502_v31 = vadd.f32 %v1038_v25, %v844_v27 }
 0x1b2   :  { %v493_v26 = vpop.f32.mrf.mxu1 }
 0x1b3   :  { %v494_v29 = vadd.f32 %v844_v27, %v493_v26  ;;  %v558_v38 = vmax.f32 %v502_v31, 0.0 }
 0x1b4   :  { %v1039_v28 = vpop.f32.mrf.mxu1 }
 0x1b5   :  { %v505_v30 = vadd.f32 %v1039_v28, %v844_v27  ;;  %v556_v36 = vmax.f32 %v494_v29, 0.0 }
 0x1b6   :  { %v496_v32 = vpop.f32.mrf.mxu1 }
 0x1b7   :  { %v497_v33 = vadd.f32 %v844_v27, %v496_v32  ;;  %v559_v34 = vmax.f32 %v505_v30, 0.0 }
 0x1b8   :  { %v1042_v35 = vpop.f32.mrf.mxu1 }
 0x1b9   :  { %v557_v37 = vmax.f32 %v497_v33, 0.0  ;;  %v573_v41 = vpack.c.bf16 %v559_v34, %v558_v38  ;;  %v518_v45 = vadd.f32 %v1042_v35, %v844_v27 }
 0x1ba   :  { %v509_v39 = vpop.f32.mrf.mxu1 }
 0x1bb   :  { %v572_v40 = vpack.c.bf16 %v557_v37, %v556_v36  ;;  %v510_v43 = vadd.f32 %v844_v27, %v509_v39  ;;  %v562_v52 = vmax.f32 %v518_v45, 0.0 }
 0x1bc   :  { %v1043_v42 = vpop.f32.mrf.mxu1 }
 0x1bd   :  { %v521_v44 = vadd.f32 %v1043_v42, %v844_v27  ;;  %1068 = vmatprep.mubr.bf16.mxu0 %v572_v40  ;;  %v560_v50 = vmax.f32 %v510_v43, 0.0 }
 0x1be   :  { %v512_v46 = vpop.f32.mrf.mxu1  ;;  %1069 = vmatmul.mubr.bf16.vlgmr.msra.gmra.mxu0 %v573_v41 }
 0x1bf   :  { %v513_v47 = vadd.f32 %v844_v27, %v512_v46  ;;  %v563_v48 = vmax.f32 %v521_v44, 0.0 }
 0x1c0   :  { %v1046_v49 = vpop.f32.mrf.mxu1 }
 0x1c1   :  { %v561_v51 = vmax.f32 %v513_v47, 0.0  ;;  %v575_v55 = vpack.c.bf16 %v563_v48, %v562_v52  ;;  %v534_v59 = vadd.f32 %v1046_v49, %v844_v27 }
 0x1c2   :  { %v525_v53 = vpop.f32.mrf.mxu1 }
 0x1c3   :  { %v574_v54 = vpack.c.bf16 %v561_v51, %v560_v50  ;;  %v526_v57 = vadd.f32 %v844_v27, %v525_v53  ;;  %v566_v2 = vmax.f32 %v534_v59, 0.0 }
 0x1c4   :  { %v1047_v56 = vpop.f32.mrf.mxu1 }
 0x1c5   :  { %v537_v58 = vadd.f32 %v1047_v56, %v844_v27  ;;  %1072 = vmatprep.mubr.bf16.mxu0 %v574_v54  ;;  %v564_v0 = vmax.f32 %v526_v57, 0.0 }
 0x1c6   :  { %v528_v60 = vpop.f32.mrf.mxu1  ;;  %1073 = vmatmul.mubr.bf16.gmra.mxu0 %v575_v55 }
 0x1c7   :  { %v529_v61 = vadd.f32 %v844_v27, %v528_v60  ;;  %v567_v62 = vmax.f32 %v537_v58, 0.0 }
 0x1c8   :  { %v1050_v63 = vpop.f32.mrf.mxu1 }
 0x1c9   :  { %v565_v1 = vmax.f32 %v529_v61, 0.0  ;;  %v577_v5 = vpack.c.bf16 %v567_v62, %v566_v2  ;;  %v550_v9 = vadd.f32 %v1050_v63, %v844_v27 }
 0x1ca   :  { %v541_v3 = vpop.f32.mrf.mxu1 }
 0x1cb   :  { %v576_v4 = vpack.c.bf16 %v565_v1, %v564_v0  ;;  %v542_v7 = vadd.f32 %v844_v27, %v541_v3  ;;  %v570_v15 = vmax.f32 %v550_v9, 0.0 }
 0x1cc   :  { %v1051_v6 = vpop.f32.mrf.mxu1 }
 0x1cd   :  { %v553_v8 = vadd.f32 %v1051_v6, %v844_v27  ;;  %1076 = vmatprep.mubr.bf16.mxu1 %v576_v4  ;;  %v568_v13 = vmax.f32 %v542_v7, 0.0 }
 0x1ce   :  { %v544_v10 = vpop.f32.mrf.mxu1  ;;  %1077 = vmatmul.mubr.bf16.vlgmr.msra.gmra.mxu1 %v577_v5 }
 0x1cf   :  { %v545_v11 = vadd.f32 %v844_v27, %v544_v10  ;;  %v571_v12 = vmax.f32 %v553_v8, 0.0 }
 0x1d1   :  { %v569_v14 = vmax.f32 %v545_v11, 0.0  ;;  %v579_v17 = vpack.c.bf16 %v571_v12, %v570_v15 }
 0x1d3   :  { %v578_v16 = vpack.c.bf16 %v569_v14, %v568_v13 }
 0x1d5   :  { %1080 = vmatprep.mubr.bf16.mxu1 %v578_v16 }
 0x1d6   :  { %1081 = vmatmul.mubr.bf16.gmra.mxu1 %v579_v17 }
 0x27e   :  { %v1070_v18 = vpop.f32.mrf.mxu0 }
 0x280   :  { %v678_v19 = vpop.f32.mrf.mxu0 }
 0x282   :  { %v1071_v20 = vpop.f32.mrf.mxu0 }
 0x283   :  { %v901_v21 = vpack.c.bf16 %v1071_v20, %v1070_v18 }
 0x284   :  { %v681_v22 = vpop.f32.mrf.mxu0 }
 0x285   :  { %933 = vst [vmem:[%s1305_s6 + $0x8] sm:$0xff] %v901_v21   ;;  %v896_v23 = vpack.c.bf16 %v681_v22, %v678_v19 }
 0x286   :  { %v1074_v24 = vpop.f32.mrf.mxu0 }
 0x287   :  { %897 = vst [vmem:[%s1305_s6] sm:$0xff] %v896_v23  }
 0x288   :  { %v694_v25 = vpop.f32.mrf.mxu0 }
 0x28a   :  { %v1075_v26 = vpop.f32.mrf.mxu0 }
 0x28b   :  { %v911_v27 = vpack.c.bf16 %v1075_v26, %v1074_v24 }
 0x28c   :  { %v697_v28 = vpop.f32.mrf.mxu0 }
 0x28d   :  { %935 = vst [vmem:[%s1305_s6 + $0x18] sm:$0xff] %v911_v27   ;;  %v906_v29 = vpack.c.bf16 %v697_v28, %v694_v25 }
 0x28e   :  { %v1078_v30 = vpop.f32.mrf.mxu1 }
 0x28f   :  { %934 = vst [vmem:[%s1305_s6 + $0x10] sm:$0xff] %v906_v29  }
 0x290   :  { %v710_v31 = vpop.f32.mrf.mxu1 }
 0x292   :  { %v1079_v32 = vpop.f32.mrf.mxu1 }
 0x293   :  { %v921_v33 = vpack.c.bf16 %v1079_v32, %v1078_v30 }
 0x294   :  { %v713_v34 = vpop.f32.mrf.mxu1 }
 0x295   :  { %937 = vst [vmem:[%s1305_s6 + $0x28] sm:$0xff] %v921_v33   ;;  %v916_v35 = vpack.c.bf16 %v713_v34, %v710_v31 }
 0x296   :  { %v1082_v36 = vpop.f32.mrf.mxu1 }
 0x297   :  { %936 = vst [vmem:[%s1305_s6 + $0x20] sm:$0xff] %v916_v35  }
 0x298   :  { %v726_v37 = vpop.f32.mrf.mxu1 }
 0x29a   :  { %v1083_v38 = vpop.f32.mrf.mxu1 }
 0x29b   :  { %v931_v39 = vpack.c.bf16 %v1083_v38, %v1082_v36 }
 0x29c   :  { %v729_v40 = vpop.f32.mrf.mxu1 }
 0x29d   :  { %939 = vst [vmem:[%s1305_s6 + $0x38] sm:$0xff] %v931_v39   ;;  %v926_v41 = vpack.c.bf16 %v729_v40, %v726_v37 }
 0x29f   :  { %938 = vst [vmem:[%s1305_s6 + $0x30] sm:$0xff] %v926_v41  }

</bundles_post_ra>
